<compile_context>
chip_gen: v7x
topology: tpu7x:2x2x1
jax: 0.10.0
libtpu: 0.0.40
codegen_flags: <defaults>
</compile_context>

<pallas_src>
import functools
import math

import jax
import jax.numpy as jnp
from jax.experimental import pallas as pl
from jax.experimental.pallas import tpu as pltpu

_GELU_C = math.sqrt(2.0 / math.pi)


def _new_gelu(x):
    # 0.5 * x * (1 + tanh(sqrt(2/pi) * (x + 0.044715 * x^3)))
    return 0.5 * x * (1.0 + jnp.tanh(_GELU_C * (x + 0.044715 * x * x * x)))


def _round_up(n, m):
    return ((n + m - 1) // m) * m


def _pick_divisor(n, candidates, fallback):
    for c in candidates:
        if c <= n and n % c == 0:
            return c
    return fallback


def _chunked_mlp(x_c, w1_ref, b1_ref, w2_ref, h_chunk, compute_dtype, gelu_dtype):
    """gelu(x @ W1 + b1) @ W2 accumulated over static h_chunk column blocks of W1 /
    row blocks of W2.  Unrolled so the MXU work of chunk k+1 can overlap the VPU/EUP
    gelu of chunk k; accumulation stays f32."""
    hidden = w1_ref.shape[1]
    n_chunks = hidden // h_chunk
    acc = None
    for c in range(n_chunks):
        lo = c * h_chunk
        h = jnp.dot(x_c, w1_ref[:, lo:lo + h_chunk],
                    preferred_element_type=jnp.float32)
        h = h + b1_ref[:, lo:lo + h_chunk]              # bias add in f32
        h = _new_gelu(h.astype(gelu_dtype))             # bf16 gelu on the fast path
        part = jnp.dot(h.astype(compute_dtype), w2_ref[lo:lo + h_chunk, :],
                       preferred_element_type=jnp.float32)
        acc = part if acc is None else acc + part
    return acc


def _mlp_kernel_resident(x_ref, w1_ref, b1_ref, w2_ref, b2_ref, o_ref, *,
                         h_chunk, compute_dtype, gelu_dtype):
    # x_ref : (tm, C)  token tile, ORIGINAL input dtype (cast here, not in the wrapper)
    # w1_ref: (C, H)   c_fc weight (in,out layout), single-copy VMEM resident
    # b1_ref: (1, H)   f32, resident
    # w2_ref: (H, C)   c_proj weight, resident
    # b2_ref: (1, C)   f32, resident
    x = x_ref[...].astype(compute_dtype)
    acc = _chunked_mlp(x, w1_ref, b1_ref, w2_ref, h_chunk, compute_dtype, gelu_dtype)
    y = acc + b2_ref[...]
    # TODO(synk): dropout is identity here (inference / p=0.0); training-mode dropout
    # would need pltpu.prng_seed + pltpu.prng_random_bits seeded per grid index.
    o_ref[...] = y.astype(o_ref.dtype)


def _mlp_kernel_streaming(x_ref, w1_ref, b1_ref, w2_ref, b2_ref, o_ref, acc_ref, *,
                          h_chunk, compute_dtype, gelu_dtype):
    # Grid = (token tiles ["parallel"], H tiles ["arbitrary" reduction]).
    # W1/b1/W2 blocks stream through the pipeline; f32 accumulator lives in VMEM
    # scratch; the output tile is written only on the last H step.
    j = pl.program_id(1)

    @pl.when(j == 0)
    def _():
        acc_ref[...] = jnp.zeros_like(acc_ref)

    x = x_ref[...].astype(compute_dtype)
    acc_ref[...] += _chunked_mlp(x, w1_ref, b1_ref, w2_ref, h_chunk,
                                 compute_dtype, gelu_dtype)

    @pl.when(j == pl.num_programs(1) - 1)
    def _():
        o_ref[...] = (acc_ref[...] + b2_ref[...]).astype(o_ref.dtype)


def _vmem_capacity_bytes():
    # Hardware query only; conservative (v7x per-core) default if unavailable.
    try:
        return int(getattr(pltpu.get_tpu_info(), "vmem_capacity_bytes", 64 << 20))
    except Exception:   # narrow purpose: never masks kernel compile/lowering errors
        return 64 << 20


def mlp_forward(x, w1, b1, w2, b2, *, tm=None, h_chunk=None, h_block=None,
                compute_dtype=jnp.bfloat16, out_dtype=None, force_streaming=False):
    """nanoGPT MLP forward.  x: (B,T,C); w1: (C,4C); b1: (4C,); w2: (4C,C); b2: (C,).

    compute_dtype  : dtype fed to the MXU (bf16 default; accumulation is always f32).
    out_dtype      : output dtype (defaults to x.dtype; pass bf16 for inference to halve
                     output HBM writeback / vst pressure).
    tm             : token-row tile (auto: 512 on 128-MiB-VMEM chips, else 256; clamped
                     so the "parallel" grid has >=2 steps when N allows).
    h_chunk        : in-kernel hidden chunk for MXU/gelu overlap (auto: <=512 divisor).
    h_block        : H grid-tile for the streaming variant (auto).
    force_streaming: force the H-streaming (weights-not-resident) variant.
    """
    B, T, C = x.shape
    H = w1.shape[1]
    assert w1.shape == (C, H) and w2.shape == (H, C)
    N = B * T

    out_dtype = jnp.dtype(out_dtype) if out_dtype is not None else jnp.dtype(x.dtype)
    cdt = jnp.dtype(compute_dtype) if compute_dtype is not None else jnp.dtype(x.dtype)
    # gelu in bf16 (packed vregs, bf16 VPU/EUP on v6e/v7x) on the fast path, else f32.
    gdt = jnp.bfloat16 if cdt == jnp.dtype(jnp.bfloat16) else jnp.float32

    vmem_cap = _vmem_capacity_bytes()

    # ---- tile sizes -----------------------------------------------------------
    if tm is None:
        tm = 512 if vmem_cap >= (96 << 20) else 256          # v5e/v6e vs v7x
    # >= 2 grid steps when N allows so both v7x TensorCores / megacore stay busy.
    tm = max(8, min(int(tm), _round_up(pl.cdiv(N, 2), 8)))
    grid_m = pl.cdiv(N, tm)       # ragged last tile handled by Pallas block padding

    if h_chunk is None:
        h_chunk = _pick_divisor(H, (512, 384, 256, 128), H)
    assert H % h_chunk == 0, "h_chunk must divide the hidden size 4*C"

    itm = cdt.itemsize
    itx = jnp.dtype(x.dtype).itemsize
    ito = out_dtype.itemsize

    weight_bytes = 2 * C * H * itm + (H + C) * 4             # W1+W2 + f32 biases
    io_bytes = 2 * tm * C * (itx + ito)                      # double-buffered x/out tiles
    resident_ws = (weight_bytes + io_bytes
                   + tm * h_chunk * 4 + tm * C * 4           # f32 chunk + accumulator
                   + (2 << 20))                              # slack
    use_streaming = force_streaming or resident_ws > vmem_cap - (8 << 20)

    # ---- host-side prep (weights cast once; x left untouched -> cast in-kernel) ----
    xf = x.reshape(N, C)                                     # no cast, no pad
    w1c = w1.astype(cdt)           # in production, store weights in cdt outside the call
    w2c = w2.astype(cdt)
    b1r = b1.reshape(1, H).astype(jnp.float32)
    b2r = b2.reshape(1, C).astype(jnp.float32)

    cost = pl.CostEstimate(
        flops=4 * N * C * H,                                 # two matmuls: 2*N*C*H each
        transcendentals=N * H,                               # tanh in new_gelu
        bytes_accessed=N * C * (itx + ito) + weight_bytes)

    if not use_streaming:
        kernel = functools.partial(_mlp_kernel_resident, h_chunk=h_chunk,
                                   compute_dtype=cdt, gelu_dtype=gdt)
        vmem_limit = int(max(32 << 20, min(vmem_cap - (8 << 20),
                                           resident_ws + (4 << 20))))
        call = pl.pallas_call(
            kernel,
            out_shape=jax.ShapeDtypeStruct((N, C), out_dtype),
            grid_spec=pltpu.PrefetchScalarGridSpec(
                num_scalar_prefetch=0,
                grid=(grid_m,),
                in_specs=[
                    pl.BlockSpec((tm, C), lambda i: (i, 0)),                # x tile
                    pl.BlockSpec(memory_space=pltpu.MemorySpace.VMEM),      # W1 resident
                    pl.BlockSpec(memory_space=pltpu.MemorySpace.VMEM),      # b1
                    pl.BlockSpec(memory_space=pltpu.MemorySpace.VMEM),      # W2 resident
                    pl.BlockSpec(memory_space=pltpu.MemorySpace.VMEM),      # b2
                ],
                out_specs=pl.BlockSpec((tm, C), lambda i: (i, 0)),
            ),
            compiler_params=pltpu.CompilerParams(
                dimension_semantics=("parallel",),           # shard tokens over TCs
                vmem_limit_bytes=vmem_limit),
            cost_estimate=cost,
        )
        out = call(xf, w1c, b1r, w2c, b2r)
    else:
        # H-streaming variant: W1 column blocks / W2 row blocks are pipelined through
        # VMEM over an "arbitrary" H grid axis; f32 accumulator in VMEM scratch.
        if h_block is None:
            h_block = _pick_divisor(H, (1024, 512, 256, 128), H)
        assert H % h_block == 0 and (h_block == H or h_block % 128 == 0)
        inner = math.gcd(h_chunk, h_block)                   # in-kernel overlap chunk
        grid_h = H // h_block

        stream_ws = (2 * 2 * C * h_block * itm + 2 * h_block * 4 + C * 4
                     + io_bytes + tm * C * 4 + tm * inner * 4 + (2 << 20))
        vmem_limit = int(max(32 << 20, min(vmem_cap - (8 << 20),
                                           stream_ws + (4 << 20))))
        kernel = functools.partial(_mlp_kernel_streaming, h_chunk=inner,
                                   compute_dtype=cdt, gelu_dtype=gdt)
        call = pl.pallas_call(
            kernel,
            out_shape=jax.ShapeDtypeStruct((N, C), out_dtype),
            grid_spec=pltpu.PrefetchScalarGridSpec(
                num_scalar_prefetch=0,
                grid=(grid_m, grid_h),
                in_specs=[
                    pl.BlockSpec((tm, C), lambda i, j: (i, 0)),        # x (held per i)
                    pl.BlockSpec((C, h_block), lambda i, j: (0, j)),   # W1 column block
                    pl.BlockSpec((1, h_block), lambda i, j: (0, j)),   # b1 block
                    pl.BlockSpec((h_block, C), lambda i, j: (j, 0)),   # W2 row block
                    pl.BlockSpec(memory_space=pltpu.MemorySpace.VMEM), # b2 resident
                ],
                out_specs=pl.BlockSpec((tm, C), lambda i, j: (i, 0)),
                scratch_shapes=[pltpu.VMEM((tm, C), jnp.float32)],
            ),
            compiler_params=pltpu.CompilerParams(
                dimension_semantics=("parallel", "arbitrary"),
                vmem_limit_bytes=vmem_limit),
            cost_estimate=cost,
        )
        out = call(xf, w1c, b1r, w2c, b2r)

    return out.reshape(B, T, C)


# ---------------------------------------------------------------------------------
# Reference + demo
# ---------------------------------------------------------------------------------
def mlp_reference(x2d, w1, b1, w2, b2):
    h = x2d @ w1 + b1
    h = _new_gelu(h)
    return h @ w2 + b2


def _torch_linear_init(key, fan_in, fan_out, dtype=jnp.float32):
    # Mimic nn.Linear default init: U(-1/sqrt(fan_in), 1/sqrt(fan_in)).
    kw, kb = jax.random.split(key)
    bound = 1.0 / math.sqrt(fan_in)
    # torch stores W as (out, in); we keep (in, out) = W.T for the kernel.
    w_t = jax.random.uniform(kw, (fan_in, fan_out), dtype, -bound, bound)
    b = jax.random.uniform(kb, (fan_out,), dtype, -bound, bound)
    return w_t, b


if __name__ == "__main__":
    key = jax.random.PRNGKey(0)
    k_x, k_fc, k_proj = jax.random.split(key, 3)

    B, T, C = 2, 8, 128            # nanoGPT-style demo: n_embd=128 -> hidden=512
    H = 4 * C

    x = jax.random.normal(k_x, (B, T, C), jnp.float32)
    w1, b1 = _torch_linear_init(k_fc, C, H)      # c_fc   (stored (in, out))
    w2, b2 = _torch_linear_init(k_proj, H, C)    # c_proj (stored (in, out))

    y_ref = mlp_reference(x.reshape(-1, C), w1, b1, w2, b2).reshape(B, T, C)

    # 1) f32 compute, resident weights, multi-chunk in-kernel H loop: tight check.
    y32 = jax.block_until_ready(
        mlp_forward(x, w1, b1, w2, b2, compute_dtype=jnp.float32, h_chunk=128))
    assert y32.shape == (B, T, C) and y32.dtype == x.dtype
    assert jnp.allclose(y32, y_ref, atol=1e-4, rtol=1e-4), "f32 resident kernel mismatch"

    # 2) f32 compute, forced H-streaming grid (exercises the accumulator variant).
    y_st = jax.block_until_ready(
        mlp_forward(x, w1, b1, w2, b2, compute_dtype=jnp.float32,
                    force_streaming=True, h_block=256, h_chunk=128))
    assert jnp.allclose(y_st, y_ref, atol=1e-4, rtol=1e-4), "f32 streaming kernel mismatch"

    # 3) Default fast path: bf16 MXU inputs + bf16 gelu, f32 accumulation.
    y16 = jax.block_until_ready(mlp_forward(x, w1, b1, w2, b2))
    assert y16.shape == (B, T, C)
    assert jnp.allclose(y16, y_ref, atol=5e-2, rtol=5e-2), "bf16 kernel mismatch"

    print("KERNEL_OK")
</pallas_src>

<mosaic_0001>
module attributes {stable_mosaic.version = 11 : i64} {
  func.func @_mlp_kernel_resident(%arg0: i32, %arg1: memref<8x128xf32, #tpu.memory_space<vmem>>, %arg2: memref<128x512xf32, #tpu.memory_space<vmem>>, %arg3: memref<1x512xf32, #tpu.memory_space<vmem>>, %arg4: memref<512x128xf32, #tpu.memory_space<vmem>>, %arg5: memref<1x128xf32, #tpu.memory_space<vmem>>, %arg6: memref<8x128xf32, #tpu.memory_space<vmem>>) attributes {dimension_semantics = [#tpu.dimension_semantics<parallel>], iteration_bounds = array<i64: 2>, scalar_prefetch = 0 : i64, scratch_operands = 0 : i64, tpu.core_type = #tpu.core_type<tc>, window_params = [{transform_indices = @transform_0, window_bounds = array<i64: 8, 128>}, {pipeline_mode = #tpu.pipeline_mode<synchronous>, transform_indices = @transform_1, window_bounds = array<i64: 128, 512>}, {pipeline_mode = #tpu.pipeline_mode<synchronous>, transform_indices = @transform_2, window_bounds = array<i64: 1, 512>}, {pipeline_mode = #tpu.pipeline_mode<synchronous>, transform_indices = @transform_3, window_bounds = array<i64: 512, 128>}, {pipeline_mode = #tpu.pipeline_mode<synchronous>, transform_indices = @transform_4, window_bounds = array<i64: 1, 128>}, {transform_indices = @transform_5, window_bounds = array<i64: 8, 128>}]} {
    %c0 = arith.constant 0 : index
    %c0_0 = arith.constant 0 : index
    %0 = vector.load %arg1[%c0, %c0_0] : memref<8x128xf32, #tpu.memory_space<vmem>>, vector<8x128xf32>
    %c0_1 = arith.constant 0 : index
    %c0_2 = arith.constant 0 : index
    %1 = vector.load %arg2[%c0_1, %c0_2] : memref<128x512xf32, #tpu.memory_space<vmem>>, vector<128x128xf32>
    %cst = arith.constant dense<0.000000e+00> : vector<8x128xf32>
    %2 = tpu.matmul %0, %1, %cst {dimension_numbers = #tpu.dot_dimension_numbers<[1], [0], [0], [1], [0, 0, 1, 1], [], []>} : vector<8x128xf32>, vector<128x128xf32>, vector<8x128xf32> -> vector<8x128xf32>
    %c0_3 = arith.constant 0 : index
    %c0_4 = arith.constant 0 : index
    %3 = vector.load %arg3[%c0_3, %c0_4] : memref<1x512xf32, #tpu.memory_space<vmem>>, vector<1x128xf32>
    %4 = vector.broadcast %3 : vector<1x128xf32> to vector<8x128xf32>
    %5 = arith.addf %2, %4 : vector<8x128xf32>
    %cst_5 = arith.constant 5.000000e-01 : f32
    %6 = vector.broadcast %cst_5 : f32 to vector<8x128xf32>
    %7 = arith.mulf %6, %5 : vector<8x128xf32>
    %cst_6 = arith.constant 4.471500e-02 : f32
    %8 = vector.broadcast %cst_6 : f32 to vector<8x128xf32>
    %9 = arith.mulf %8, %5 : vector<8x128xf32>
    %10 = arith.mulf %9, %5 : vector<8x128xf32>
    %11 = arith.mulf %10, %5 : vector<8x128xf32>
    %12 = arith.addf %5, %11 : vector<8x128xf32>
    %cst_7 = arith.constant 0.797884583 : f32
    %13 = vector.broadcast %cst_7 : f32 to vector<8x128xf32>
    %14 = arith.mulf %13, %12 : vector<8x128xf32>
    %15 = math.tanh %14 : vector<8x128xf32>
    %cst_8 = arith.constant 1.000000e+00 : f32
    %16 = vector.broadcast %cst_8 : f32 to vector<8x128xf32>
    %17 = arith.addf %16, %15 : vector<8x128xf32>
    %18 = arith.mulf %7, %17 : vector<8x128xf32>
    %c0_9 = arith.constant 0 : index
    %c0_10 = arith.constant 0 : index
    %19 = vector.load %arg4[%c0_9, %c0_10] : memref<512x128xf32, #tpu.memory_space<vmem>>, vector<128x128xf32>
    %cst_11 = arith.constant dense<0.000000e+00> : vector<8x128xf32>
    %20 = tpu.matmul %18, %19, %cst_11 {dimension_numbers = #tpu.dot_dimension_numbers<[1], [0], [0], [1], [0, 0, 1, 1], [], []>} : vector<8x128xf32>, vector<128x128xf32>, vector<8x128xf32> -> vector<8x128xf32>
    %c0_12 = arith.constant 0 : index
    %c128 = arith.constant 128 : index
    %21 = vector.load %arg2[%c0_12, %c128] : memref<128x512xf32, #tpu.memory_space<vmem>>, vector<128x128xf32>
    %cst_13 = arith.constant dense<0.000000e+00> : vector<8x128xf32>
    %22 = tpu.matmul %0, %21, %cst_13 {dimension_numbers = #tpu.dot_dimension_numbers<[1], [0], [0], [1], [0, 0, 1, 1], [], []>} : vector<8x128xf32>, vector<128x128xf32>, vector<8x128xf32> -> vector<8x128xf32>
    %c0_14 = arith.constant 0 : index
    %c128_15 = arith.constant 128 : index
    %23 = vector.load %arg3[%c0_14, %c128_15] : memref<1x512xf32, #tpu.memory_space<vmem>>, vector<1x128xf32>
    %24 = vector.broadcast %23 : vector<1x128xf32> to vector<8x128xf32>
    %25 = arith.addf %22, %24 : vector<8x128xf32>
    %cst_16 = arith.constant 5.000000e-01 : f32
    %26 = vector.broadcast %cst_16 : f32 to vector<8x128xf32>
    %27 = arith.mulf %26, %25 : vector<8x128xf32>
    %cst_17 = arith.constant 4.471500e-02 : f32
    %28 = vector.broadcast %cst_17 : f32 to vector<8x128xf32>
    %29 = arith.mulf %28, %25 : vector<8x128xf32>
    %30 = arith.mulf %29, %25 : vector<8x128xf32>
    %31 = arith.mulf %30, %25 : vector<8x128xf32>
    %32 = arith.addf %25, %31 : vector<8x128xf32>
    %cst_18 = arith.constant 0.797884583 : f32
    %33 = vector.broadcast %cst_18 : f32 to vector<8x128xf32>
    %34 = arith.mulf %33, %32 : vector<8x128xf32>
    %35 = math.tanh %34 : vector<8x128xf32>
    %cst_19 = arith.constant 1.000000e+00 : f32
    %36 = vector.broadcast %cst_19 : f32 to vector<8x128xf32>
    %37 = arith.addf %36, %35 : vector<8x128xf32>
    %38 = arith.mulf %27, %37 : vector<8x128xf32>
    %c128_20 = arith.constant 128 : index
    %c0_21 = arith.constant 0 : index
    %39 = vector.load %arg4[%c128_20, %c0_21] : memref<512x128xf32, #tpu.memory_space<vmem>>, vector<128x128xf32>
    %cst_22 = arith.constant dense<0.000000e+00> : vector<8x128xf32>
    %40 = tpu.matmul %38, %39, %cst_22 {dimension_numbers = #tpu.dot_dimension_numbers<[1], [0], [0], [1], [0, 0, 1, 1], [], []>} : vector<8x128xf32>, vector<128x128xf32>, vector<8x128xf32> -> vector<8x128xf32>
    %41 = arith.addf %20, %40 : vector<8x128xf32>
    %c0_23 = arith.constant 0 : index
    %c256 = arith.constant 256 : index
    %42 = vector.load %arg2[%c0_23, %c256] : memref<128x512xf32, #tpu.memory_space<vmem>>, vector<128x128xf32>
    %cst_24 = arith.constant dense<0.000000e+00> : vector<8x128xf32>
    %43 = tpu.matmul %0, %42, %cst_24 {dimension_numbers = #tpu.dot_dimension_numbers<[1], [0], [0], [1], [0, 0, 1, 1], [], []>} : vector<8x128xf32>, vector<128x128xf32>, vector<8x128xf32> -> vector<8x128xf32>
    %c0_25 = arith.constant 0 : index
    %c256_26 = arith.constant 256 : index
    %44 = vector.load %arg3[%c0_25, %c256_26] : memref<1x512xf32, #tpu.memory_space<vmem>>, vector<1x128xf32>
    %45 = vector.broadcast %44 : vector<1x128xf32> to vector<8x128xf32>
    %46 = arith.addf %43, %45 : vector<8x128xf32>
    %cst_27 = arith.constant 5.000000e-01 : f32
    %47 = vector.broadcast %cst_27 : f32 to vector<8x128xf32>
    %48 = arith.mulf %47, %46 : vector<8x128xf32>
    %cst_28 = arith.constant 4.471500e-02 : f32
    %49 = vector.broadcast %cst_28 : f32 to vector<8x128xf32>
    %50 = arith.mulf %49, %46 : vector<8x128xf32>
    %51 = arith.mulf %50, %46 : vector<8x128xf32>
    %52 = arith.mulf %51, %46 : vector<8x128xf32>
    %53 = arith.addf %46, %52 : vector<8x128xf32>
    %cst_29 = arith.constant 0.797884583 : f32
    %54 = vector.broadcast %cst_29 : f32 to vector<8x128xf32>
    %55 = arith.mulf %54, %53 : vector<8x128xf32>
    %56 = math.tanh %55 : vector<8x128xf32>
    %cst_30 = arith.constant 1.000000e+00 : f32
    %57 = vector.broadcast %cst_30 : f32 to vector<8x128xf32>
    %58 = arith.addf %57, %56 : vector<8x128xf32>
    %59 = arith.mulf %48, %58 : vector<8x128xf32>
    %c256_31 = arith.constant 256 : index
    %c0_32 = arith.constant 0 : index
    %60 = vector.load %arg4[%c256_31, %c0_32] : memref<512x128xf32, #tpu.memory_space<vmem>>, vector<128x128xf32>
    %cst_33 = arith.constant dense<0.000000e+00> : vector<8x128xf32>
    %61 = tpu.matmul %59, %60, %cst_33 {dimension_numbers = #tpu.dot_dimension_numbers<[1], [0], [0], [1], [0, 0, 1, 1], [], []>} : vector<8x128xf32>, vector<128x128xf32>, vector<8x128xf32> -> vector<8x128xf32>
    %62 = arith.addf %41, %61 : vector<8x128xf32>
    %c0_34 = arith.constant 0 : index
    %c384 = arith.constant 384 : index
    %63 = vector.load %arg2[%c0_34, %c384] : memref<128x512xf32, #tpu.memory_space<vmem>>, vector<128x128xf32>
    %cst_35 = arith.constant dense<0.000000e+00> : vector<8x128xf32>
    %64 = tpu.matmul %0, %63, %cst_35 {dimension_numbers = #tpu.dot_dimension_numbers<[1], [0], [0], [1], [0, 0, 1, 1], [], []>} : vector<8x128xf32>, vector<128x128xf32>, vector<8x128xf32> -> vector<8x128xf32>
    %c0_36 = arith.constant 0 : index
    %c384_37 = arith.constant 384 : index
    %65 = vector.load %arg3[%c0_36, %c384_37] : memref<1x512xf32, #tpu.memory_space<vmem>>, vector<1x128xf32>
    %66 = vector.broadcast %65 : vector<1x128xf32> to vector<8x128xf32>
    %67 = arith.addf %64, %66 : vector<8x128xf32>
    %cst_38 = arith.constant 5.000000e-01 : f32
    %68 = vector.broadcast %cst_38 : f32 to vector<8x128xf32>
    %69 = arith.mulf %68, %67 : vector<8x128xf32>
    %cst_39 = arith.constant 4.471500e-02 : f32
    %70 = vector.broadcast %cst_39 : f32 to vector<8x128xf32>
    %71 = arith.mulf %70, %67 : vector<8x128xf32>
    %72 = arith.mulf %71, %67 : vector<8x128xf32>
    %73 = arith.mulf %72, %67 : vector<8x128xf32>
    %74 = arith.addf %67, %73 : vector<8x128xf32>
    %cst_40 = arith.constant 0.797884583 : f32
    %75 = vector.broadcast %cst_40 : f32 to vector<8x128xf32>
    %76 = arith.mulf %75, %74 : vector<8x128xf32>
    %77 = math.tanh %76 : vector<8x128xf32>
    %cst_41 = arith.constant 1.000000e+00 : f32
    %78 = vector.broadcast %cst_41 : f32 to vector<8x128xf32>
    %79 = arith.addf %78, %77 : vector<8x128xf32>
    %80 = arith.mulf %69, %79 : vector<8x128xf32>
    %c384_42 = arith.constant 384 : index
    %c0_43 = arith.constant 0 : index
    %81 = vector.load %arg4[%c384_42, %c0_43] : memref<512x128xf32, #tpu.memory_space<vmem>>, vector<128x128xf32>
    %cst_44 = arith.constant dense<0.000000e+00> : vector<8x128xf32>
    %82 = tpu.matmul %80, %81, %cst_44 {dimension_numbers = #tpu.dot_dimension_numbers<[1], [0], [0], [1], [0, 0, 1, 1], [], []>} : vector<8x128xf32>, vector<128x128xf32>, vector<8x128xf32> -> vector<8x128xf32>
    %83 = arith.addf %62, %82 : vector<8x128xf32>
    %c0_45 = arith.constant 0 : index
    %c0_46 = arith.constant 0 : index
    %84 = vector.load %arg5[%c0_45, %c0_46] : memref<1x128xf32, #tpu.memory_space<vmem>>, vector<1x128xf32>
    %85 = vector.broadcast %84 : vector<1x128xf32> to vector<8x128xf32>
    %86 = arith.addf %83, %85 : vector<8x128xf32>
    %c0_47 = arith.constant 0 : index
    %c0_48 = arith.constant 0 : index
    %87 = vector.load %arg6[%c0_47, %c0_48] : memref<8x128xf32, #tpu.memory_space<vmem>>, vector<8x128xf32>
    tpu.vector_store %arg6[%c0_47, %c0_48], %86 {strides = array<i32>} : memref<8x128xf32, #tpu.memory_space<vmem>>, vector<8x128xf32>,
    return
  }
  func.func @transform_0(%arg0: i32) -> (i32, i32) {
    %c0_i32 = arith.constant 0 : i32
    %c0_i32_0 = arith.constant 0 : i32
    return %arg0, %c0_i32 : i32, i32
  }
  func.func @transform_1(%arg0: i32) -> (i32, i32) {
    %c0_i32 = arith.constant 0 : i32
    %c0_i32_0 = arith.constant 0 : i32
    %c0_i32_1 = arith.constant 0 : i32
    return %c0_i32, %c0_i32_0 : i32, i32
  }
  func.func @transform_2(%arg0: i32) -> (i32, i32) {
    %c0_i32 = arith.constant 0 : i32
    %c0_i32_0 = arith.constant 0 : i32
    %c0_i32_1 = arith.constant 0 : i32
    return %c0_i32, %c0_i32_0 : i32, i32
  }
  func.func @transform_3(%arg0: i32) -> (i32, i32) {
    %c0_i32 = arith.constant 0 : i32
    %c0_i32_0 = arith.constant 0 : i32
    %c0_i32_1 = arith.constant 0 : i32
    return %c0_i32, %c0_i32_0 : i32, i32
  }
  func.func @transform_4(%arg0: i32) -> (i32, i32) {
    %c0_i32 = arith.constant 0 : i32
    %c0_i32_0 = arith.constant 0 : i32
    %c0_i32_1 = arith.constant 0 : i32
    return %c0_i32, %c0_i32_0 : i32, i32
  }
  func.func @transform_5(%arg0: i32) -> (i32, i32) {
    %c0_i32 = arith.constant 0 : i32
    %c0_i32_0 = arith.constant 0 : i32
    return %arg0, %c0_i32 : i32, i32
  }
}

</mosaic_0001>

<bundles_post_ra>
// kernel: tpu_custom_call.1
= control target key start
LH: loop header
LB: loop body
LE: loop exit
PB: predicated region body
PF: predicated region fallthrough
CT: control target
= control target key end

     0   :  { %10 = vsyncpa [#allocation3], 0  ;;  %s2386_s0 = inlined_call_operand.hbm [shape: f32[16,128], index: 0, kind: input, shape index: {}]   ;;  %s2387_s1 = inlined_call_operand.hbm [shape: f32[128,512], index: 1, kind: input, shape index: {}]   ;;  %s2388_s2 = inlined_call_operand.vmem [shape: f32[1,512], index: 2, kind: input, shape index: {}]   ;;  %s2389_s3 = inlined_call_operand.hbm [shape: f32[512,128], index: 3, kind: input, shape index: {}]   ;;  %s2390_s4 = inlined_call_operand.vmem [shape: f32[1,128], index: 4, kind: input, shape index: {}]   ;;  %s2391_s5 = inlined_call_operand.hbm [shape: f32[16,128], index: 5, kind: output, shape index: {}]  }
   0x1   :  { %12 = vsyncpa [#allocation3 + $0x1], 0 }
   0x2   :  { %13 = vsyncpa [#allocation6], 0 }
   0x3   :  { %14 = vsyncpa [#allocation4], 0 }
   0x4   :  { %16 = vsyncpa [#allocation4 + $0x1], 0  ;;  %s2046_s18 = smov 0   ;;  %s2048_s19 = smov 0  }
   0x5   :  { %s2050_s20 = smov 0   ;;  %s2052_s21 = smov 0  }
   0x6 LB: > { %s2067_s22 = sadd.s32 4294967295, %s2003_s21   ;;  %s1136_s23 = sadd.s32 4294967294, %s2003_s21   ;;  %s2003_s21 = sphi %s2052_s21, %s2411_s21   ;;  %s1999_s20 = sphi %s2050_s20, %s2410_s20   ;;  %s1995_s19 = sphi %s2048_s19, %s2409_s19   ;;  %s1991_s18 = sphi %s2046_s18, %s2408_s18  }
   0x7   : > { %p42_p0 = scmp.ne.s32.totalorder %s1995_s19, %s1991_s18  ;;  %p2392_p1 = scmp.eq.s32.totalorder %s2067_s22, 0 }
   0x8   : > { %p156_p3 = scmp.eq.s32.totalorder %s1136_s23, 1  ;;  %p1137_p5 = scmp.ge.s32.totalorder %s2003_s21, 1 }
   0x9   : > { %p2076_p4 = por %p2392_p1, %p42_p0  ;;  %p163_p7 = scmp.lt.s32.totalorder %s2003_s21, 3 }
   0xa   : > { %p2081_p6 = por %p156_p3, %p42_p0  ;;  %s2005_s27 = smov [#allocation5]  }
   0xb   : > { %s2395_s24 = scalar_select %p2076_p4, 1, 0 }
   0xc   : > { %s2396_s25 = scalar_select %p2081_p6, 1, 0 }
   0xd   : > { %p2086_p8 = pnand %p1137_p5, %p163_p7  ;;  %s175_s28 = sshll.u32 %s2005_s27, 4  ;;  %s2090_s28 = int_to_ptr.vmem [resolvable:$true] %s175_s28 }
   0xe   : > { %s2006_s30 = smov [#allocation7]   ;;  %s1847_s9 = scalar_lea.hbm %s2387_s1, 8192 }
   0xf   : > { %p1777_p9 = pneg %p2086_p8  ;;  %s191_s6 = sshll.u32 %s2006_s30, 4  ;;  %s2101_s6 = int_to_ptr.vmem [resolvable:$true] %s191_s6 }
  0x10   : > { %p1848_p12 = scmp.ne.s32.totalorder %s2387_s1, %s1847_s9  ;;  %p1854_p5 = scmp.lt.u32.totalorder %s1847_s9, %s2387_s1 }
  0x11   : > { %p2097_p11 = pnand %p1777_p9, %p2392_p1 }
  0x13   : > { %p1849_p13 = pneg %p2097_p11 }
  0x15   : > { %p1850_p0 = pnand %p1849_p13, %p1848_p12 }
  0x17   : > { %p1851_p3 = pneg %p1850_p0 }
  0x19   : > { %p1856_p7 = pnand %p1854_p5, %p1851_p3 }
  0x1b   : > { %1859 = shalt.err (!%p1856_p7)
}
  0x1c   : > { %s1860_s14 = scalar_lea.vmem %s2090_s28, 8192  ;;  %p1868_p2 = scmp.lt.s32.totalorder %s2090_s28, %s2090_s28 }
  0x1d   : > { %p1861_p9 = scmp.ne.s32.totalorder %s2090_s28, %s1860_s14  ;;  %p1869_p12 = scmp.lt.s32.totalorder %s1860_s14, %s1860_s14 }
  0x1f   : > { %p1863_p10 = pnand %p1861_p9, %p1849_p13  ;;  %p1870_p0 = por %p1869_p12, %p1868_p2 }
  0x21   : > { %p1864_p1 = pneg %p1863_p10 }
  0x23   : > { %p1871_p6 = pnand %p1870_p0, %p1864_p1 }
  0x25   : > { %1874 = shalt.err (!%p1871_p6)
}
  0x26   : > { %s2007_s15 = smov 512   ;;  %s2008_s16 = smov 32  }
  0x27   : > { %1780 = dma.hbm_to_vmem [thread:$0]  (!%p2097_p11), %s2387_s1, 8192, %s2090_s28, [#allocation6], %s2007_s15, %s2007_s15, %s2008_s16  }
  0x28   : > { %s1875_s7 = scalar_lea.hbm %s2389_s3, 8192 }
  0x29   : > { %p1876_p2 = scmp.ne.s32.totalorder %s2389_s3, %s1875_s7  ;;  %p1882_p10 = scmp.lt.u32.totalorder %s1875_s7, %s2389_s3 }
  0x2b   : > { %p1878_p1 = pnand %p1876_p2, %p1849_p13 }
  0x2d   : > { %p1879_p6 = pneg %p1878_p1 }
  0x2f   : > { %p1884_p3 = pnand %p1882_p10, %p1879_p6 }
  0x31   : > { %1887 = shalt.err (!%p1884_p3)
}
  0x32   : > { %s1888_s28 = scalar_lea.vmem %s2101_s6, 8192  ;;  %p1896_p12 = scmp.lt.s32.totalorder %s2101_s6, %s2101_s6 }
  0x33   : > { %p1889_p5 = scmp.ne.s32.totalorder %s2101_s6, %s1888_s28  ;;  %p1897_p0 = scmp.lt.s32.totalorder %s1888_s28, %s1888_s28 }
  0x35   : > { %p1891_p7 = pnand %p1889_p5, %p1849_p13  ;;  %p1898_p2 = por %p1897_p0, %p1896_p12 }
  0x37   : > { %p1892_p9 = pneg %p1891_p7 }
  0x39   : > { %p1899_p1 = pnand %p1898_p2, %p1892_p9 }
  0x3b   : > { %1902 = shalt.err (!%p1899_p1)
}
  0x3c   : > { %s2009_s12 = smov 128   ;;  %s2010_s13 = smov 8  }
  0x3d   : > { %1783 = dma.hbm_to_vmem [thread:$0]  (!%p2097_p11), %s2389_s3, 8192, %s2101_s6, [#allocation6], %s2009_s12, %s2009_s12, %s2010_s13  }
  0x3e   : > { %s2156_s16 = sadd.s32 1, %s2003_s21   ;;  %s29_s23 = sadd.s32 1, %s1999_s20 }
  0x3f   : > { %s26_s17 = ssub.s32 %s2003_s21, %s2156_s16  ;;  %p36_p6 = scmp.ne.s32.totalorder %s1999_s20, %s1995_s19 }
  0x40   : > { %p27_p13 = scmp.eq.s32.totalorder %s26_s17, 0  ;;  %p37_p10 = scmp.eq.s32.totalorder %s2003_s21, 0 }
  0x41   : > { %p2399_p5 = scmp.eq.s32.totalorder %s2067_s22, 1  ;;  %p1794_p9 = scmp.lt.s32.totalorder %s2003_s21, 2 }
  0x42   : > { %s2165_s27 = scalar_select %p27_p13, %s1999_s20, %s29_s23  }
  0x43   : > { %p38_p3 = por %p37_p10, %p36_p6  ;;  %p2169_p7 = por %p2399_p5, %p36_p6 }
  0x44   : > { %s208_s29 = sand.u32 1, %s1999_s20   ;;  %s1142_s6 = sshll.u32 %s2003_s21, 7 }
  0x45   : > { %s2400_s30 = scalar_select %p2169_p7, 1, 0 }
  0x46   : > { %s1141_s7 = sshll.u32 %s208_s29, 3  ;;  %s2179_s10 = scalar_lea.hbm %s2386_s0, %s1142_s6 }
  0x47   : > { %s212_s11 = scalar_lea.vmem [#allocation2], %s1141_s7  ;;  %p2183_p11 = pnand %p1794_p9, %p38_p3 }
  0x48   : > { %s219_s28 = sshll.u32 %s212_s11, 4  ;;  %s209_s13 = scalar_lea.sflag [#allocation3], %s208_s29  ;;  %s2181_s28 = int_to_ptr.vmem [resolvable:$true] %s219_s28 }
  0x49   : > { %s1903_s14 = scalar_lea.hbm %s2179_s10, 128  ;;  %p1905_p0 = pneg %p2183_p11 }
  0x4a   : > { %p1904_p12 = scmp.ne.s32.totalorder %s2179_s10, %s1903_s14  ;;  %s1908_s23 = scalar_lea.hbm %s2386_s0, 256 }
  0x4b   : > { %p1909_p13 = scmp.lt.u32.totalorder %s2179_s10, %s2386_s0  ;;  %p1910_p6 = scmp.lt.u32.totalorder %s1908_s23, %s1903_s14 }
  0x4c   : > { %p1906_p2 = pnand %p1905_p0, %p1904_p12  ;;  %p1912_p3 = scmp.lt.u32.totalorder %s1903_s14, %s2179_s10 }
  0x4d   : > { %p1911_p10 = por %p1910_p6, %p1909_p13 }
  0x4e   : > { %p1907_p1 = pneg %p1906_p2 }
  0x4f   : > { %p1913_p5 = por %p1912_p3, %p1911_p10 }
  0x51   : > { %p1914_p9 = pnand %p1913_p5, %p1907_p1 }
  0x53   : > { %1917 = shalt.err (!%p1914_p9)
}
  0x54   : > { %s1918_s29 = scalar_lea.vmem %s2181_s28, 128  ;;  %s2011_s8 = smov [#allocation2]  }
  0x55   : > { %p1919_p12 = scmp.ne.s32.totalorder %s2181_s28, %s1918_s29  ;;  %s1923_s9 = sshll.u32 %s2011_s8, 4  ;;  %s1924_s9 = int_to_ptr.vmem [resolvable:$false] %s1923_s9 }
  0x56   : > { %s1925_s11 = scalar_lea.vmem %s1924_s9, 256  ;;  %p1926_p4 = scmp.lt.s32.totalorder %s2181_s28, %s1924_s9 }
  0x57   : > { %p1921_p2 = pnand %p1919_p12, %p1905_p0  ;;  %p1927_p13 = scmp.lt.s32.totalorder %s1925_s11, %s1918_s29 }
  0x59   : > { %p1922_p7 = pneg %p1921_p2  ;;  %p1928_p6 = por %p1927_p13, %p1926_p4 }
  0x5b   : > { %p1929_p10 = pnand %p1928_p6, %p1922_p7 }
  0x5d   : > { %1932 = shalt.err (!%p1929_p10)
}
  0x5e   : > { %1787 = dma.hbm_to_vmem [thread:$0]  (!%p2183_p11), %s2179_s10, 128, %s2181_s28, %s209_s13  }
  0x5f   : > { %228 = sbr.rel (%p2086_p8) target bundleno = 914 (0x392), region = 40  ;;  %s2215_s14 = sand.u32 (!%p2086_p8), 1, %s1995_s19  }
  0x60   : > { %s1144_s15 = sshll.u32 (!%p2086_p8), %s2215_s14, 3  ;;  %s231_s17 = scalar_lea.sflag (!%p2086_p8), [#allocation3], %s2215_s14 }
  0x61   : > { %s2221_s23 = scalar_lea.vmem (!%p2086_p8), [#allocation2], %s1144_s15  ;;  %p2402_p4 = scmp.ne.s32.totalorder (!%p2086_p8), %s2395_s24, 0 }
  0x66   : > { %1978 = dma.done.wait (%p2402_p4), %s231_s17, 128  }
  0x67   : > { %1980 = vsyncadd (%p2402_p4), %s231_s17, 4294967168  ;;  %p2403_p7 = scmp.eq.s32.totalorder %s2067_s22, 0 }
  0x69   : > { %1982 = dma.done.wait (%p2403_p7), [#allocation6], 16384   ;;  %p2404_p8 = pmov %p2403_p7 }
  0x6a   : > { %v2012_v0 = vmov 0.0|0.0   ;;  %vm2013_vm0 = vmmov 0   ;;  %v2014_v1 = vmov 0.0   ;;  %v270_v2 = vld [vmem:[#allocation5] sm:$0xff]  ;;  %v388_v4 = vld [vmem:[#allocation5 + $0x8] sm:$0xff]  ;;  %v2252_v54 = vld [vmem:[%s2221_s23] sm:$0xff] }
  0x6b   : > { %1984 = vsyncadd (%p2404_p8), [#allocation6], 4294950912  ;;  %1573 = vmatprep.subr.bf16.mxu0 %v2012_v0  ;;  %1597 = vmatprep.subr.bf16.mxu1 %v2012_v0  ;;  %v271_v3 = vld [vmem:[#allocation5 + $0x20] sm:$0xff]  ;;  %v389_v6 = vld [vmem:[#allocation5 + $0x28] sm:$0xff]  ;;  %s1154_s9 = sshll.u32 %s2067_s22, 7  ;;  %s268_s11 = scalar_lea.vmem [#allocation8], %s1144_s15 }
  0x6c   : > { %1325 = vmatprep.mubr.msk.f32.mxu0 %vm2013_vm0, %v2014_v1  ;;  %1360 = vmatprep.mubr.msk.f32.mxu1 %vm2013_vm0, %v2014_v1  ;;  %v1574_v5 = vpack.c.bf16 %v271_v3, %v270_v2  ;;  %v272_v7 = vld [vmem:[#allocation5 + $0x40] sm:$0xff]  ;;  %v1598_v9 = vpack.c.bf16 %v389_v6, %v388_v4  ;;  %v390_v10 = vld [vmem:[#allocation5 + $0x48] sm:$0xff]  ;;  %v492_v57 = vld [vmem:[#allocation7 + $0x90] sm:$0xff]  ;;  %s1047_s17 = sshll.u32 %s268_s11, 4  ;;  %s2342_s26 = scalar_lea.hbm %s2391_s5, %s1154_s9  ;;  %s2344_s17 = int_to_ptr.vmem [resolvable:$true] %s1047_s17 }
  0x6d   : > { %v273_v8 = vld [vmem:[#allocation5 + $0x60] sm:$0xff]  ;;  %v391_v11 = vld [vmem:[#allocation5 + $0x68] sm:$0xff]  ;;  %v493_v58 = vld [vmem:[#allocation7 + $0x98] sm:$0xff]  ;;  %s1034_s10 = scalar_lea.sflag [#allocation4], %s2215_s14  ;;  %s1933_s28 = scalar_lea.vmem %s2344_s17, 128 }
  0x6e   : > { %1575 = vmatpush3.bf16.msra.mxu0 %v1574_v5  ;;  %v1577_v12 = vpack.c.bf16 %v273_v8, %v272_v7  ;;  %1599 = vmatpush3.bf16.msra.mxu1 %v1598_v9  ;;  %v1601_v13 = vpack.c.bf16 %v391_v11, %v390_v10  ;;  %v274_v14 = vld [vmem:[#allocation5 + $0x80] sm:$0xff]  ;;  %v392_v16 = vld [vmem:[#allocation5 + $0x88] sm:$0xff]  ;;  %v1625_v59 = vpack.c.bf16 %v493_v58, %v492_v57  ;;  %v374_v60 = vld [vmem:[#allocation7 + $0x10] sm:$0xff]  ;;  %p1934_p11 = scmp.ne.s32.totalorder %s2344_s17, %s1933_s28  ;;  %p2405_p0 = scmp.ne.s32.totalorder %s2400_s30, 0 }
  0x6f   : > { %1576 = vmatprep.subr.bf16.mxu0 %v2012_v0  ;;  %v275_v15 = vld [vmem:[#allocation5 + $0xa0] sm:$0xff]  ;;  %1600 = vmatprep.subr.bf16.mxu1 %v2012_v0  ;;  %v393_v17 = vld [vmem:[#allocation5 + $0xa8] sm:$0xff]  ;;  %v375_v61 = vld [vmem:[#allocation7 + $0x18] sm:$0xff]  ;;  %s2015_s22 = smov [#allocation8]  }
  0x70   : > { %v1580_v18 = vpack.c.bf16 %v275_v15, %v274_v14  ;;  %v1604_v19 = vpack.c.bf16 %v393_v17, %v392_v16  ;;  %v276_v20 = vld [vmem:[#allocation5 + $0xc0] sm:$0xff]  ;;  %v394_v22 = vld [vmem:[#allocation5 + $0xc8] sm:$0xff]  ;;  %v1649_v62 = vpack.c.bf16 %v375_v61, %v374_v60  ;;  %v496_v7 = vld [vmem:[#allocation7 + $0xb0] sm:$0xff]  ;;  %p1935_p1 = pnand %p1934_p11, %p2405_p0  ;;  %s1937_s15 = sshll.u32 %s2015_s22, 4  ;;  %s1938_s15 = int_to_ptr.vmem [resolvable:$false] %s1937_s15 }
  0x71   : > { %v277_v21 = vld [vmem:[#allocation5 + $0xe0] sm:$0xff]  ;;  %v395_v23 = vld [vmem:[#allocation5 + $0xe8] sm:$0xff]  ;;  %v497_v8 = vld [vmem:[#allocation7 + $0xb8] sm:$0xff]  ;;  %s1939_s12 = scalar_lea.vmem %s1938_s15, 256  ;;  %p1940_p5 = scmp.lt.s32.totalorder %s2344_s17, %s1938_s15 }
  0x72   : > { %1578 = vmatpush3.bf16.msra.mxu0 %v1577_v12  ;;  %1602 = vmatpush3.bf16.msra.mxu1 %v1601_v13  ;;  %v1583_v24 = vpack.c.bf16 %v277_v21, %v276_v20  ;;  %v1607_v25 = vpack.c.bf16 %v395_v23, %v394_v22  ;;  %v278_v26 = vld [vmem:[#allocation5 + $0x100] sm:$0xff]  ;;  %v396_v28 = vld [vmem:[#allocation5 + $0x108] sm:$0xff]  ;;  %v1631_v9 = vpack.c.bf16 %v497_v8, %v496_v7  ;;  %v378_v10 = vld [vmem:[#allocation7 + $0x30] sm:$0xff]  ;;  %p1936_p3 = pneg %p1935_p1  ;;  %p1941_p9 = scmp.lt.s32.totalorder %s1939_s12, %s1933_s28 }
  0x73   : > { %1579 = vmatprep.subr.bf16.mxu0 %v2012_v0  ;;  %1603 = vmatprep.subr.bf16.mxu1 %v2012_v0  ;;  %v279_v27 = vld [vmem:[#allocation5 + $0x120] sm:$0xff]  ;;  %v397_v29 = vld [vmem:[#allocation5 + $0x128] sm:$0xff]  ;;  %v379_v11 = vld [vmem:[#allocation7 + $0x38] sm:$0xff] }
  0x74   : > { %v1586_v30 = vpack.c.bf16 %v279_v27, %v278_v26  ;;  %v1610_v31 = vpack.c.bf16 %v397_v29, %v396_v28  ;;  %v280_v32 = vld [vmem:[#allocation5 + $0x140] sm:$0xff]  ;;  %v398_v34 = vld [vmem:[#allocation5 + $0x148] sm:$0xff]  ;;  %v1655_v12 = vpack.c.bf16 %v379_v11, %v378_v10  ;;  %v382_v21 = vld [vmem:[#allocation7 + $0x50] sm:$0xff]  ;;  %p1942_p12 = por %p1941_p9, %p1940_p5 }
  0x75   : > { %v281_v33 = vld [vmem:[#allocation5 + $0x160] sm:$0xff]  ;;  %v399_v35 = vld [vmem:[#allocation5 + $0x168] sm:$0xff]  ;;  %v383_v22 = vld [vmem:[#allocation7 + $0x58] sm:$0xff] }
  0x76   : > { %1581 = vmatpush3.bf16.msra.mxu0 %v1580_v18  ;;  %1605 = vmatpush3.bf16.msra.mxu1 %v1604_v19  ;;  %v1589_v36 = vpack.c.bf16 %v281_v33, %v280_v32  ;;  %v1613_v37 = vpack.c.bf16 %v399_v35, %v398_v34  ;;  %v282_v38 = vld [vmem:[#allocation5 + $0x180] sm:$0xff]  ;;  %v400_v40 = vld [vmem:[#allocation5 + $0x188] sm:$0xff]  ;;  %v500_v18 = vld [vmem:[#allocation7 + $0xd0] sm:$0xff]  ;;  %p1943_p2 = pnand %p1942_p12, %p1936_p3 }
  0x77   : > { %1582 = vmatprep.subr.bf16.mxu0 %v2012_v0  ;;  %1606 = vmatprep.subr.bf16.mxu1 %v2012_v0  ;;  %v283_v39 = vld [vmem:[#allocation5 + $0x1a0] sm:$0xff]  ;;  %v401_v41 = vld [vmem:[#allocation5 + $0x1a8] sm:$0xff]  ;;  %v501_v19 = vld [vmem:[#allocation7 + $0xd8] sm:$0xff] }
  0x78   : > { %v1592_v42 = vpack.c.bf16 %v283_v39, %v282_v38  ;;  %v1616_v43 = vpack.c.bf16 %v401_v41, %v400_v40  ;;  %v284_v44 = vld [vmem:[#allocation5 + $0x1c0] sm:$0xff]  ;;  %v402_v46 = vld [vmem:[#allocation5 + $0x1c8] sm:$0xff]  ;;  %v1637_v23 = vpack.c.bf16 %v501_v19, %v500_v18  ;;  %v505_v32 = vld [vmem:[#allocation7 + $0xf8] sm:$0xff] }
  0x79   : > { %v285_v45 = vld [vmem:[#allocation5 + $0x1e0] sm:$0xff]  ;;  %v403_v47 = vld [vmem:[#allocation5 + $0x1e8] sm:$0xff]  ;;  %v386_v33 = vld [vmem:[#allocation7 + $0x70] sm:$0xff] }
  0x7a   : > { %1584 = vmatpush3.bf16.msra.mxu0 %v1583_v24  ;;  %1608 = vmatpush3.bf16.msra.mxu1 %v1607_v25  ;;  %v1595_v48 = vpack.c.bf16 %v285_v45, %v284_v44  ;;  %v1619_v49 = vpack.c.bf16 %v403_v47, %v402_v46  ;;  %v490_v50 = vld [vmem:[#allocation7 + $0x80] sm:$0xff]  ;;  %v491_v51 = vld [vmem:[#allocation7 + $0x88] sm:$0xff]  ;;  %v1661_v24 = vpack.c.bf16 %v383_v22, %v382_v21  ;;  %v387_v34 = vld [vmem:[#allocation7 + $0x78] sm:$0xff] }
  0x7b   : > { %1585 = vmatprep.subr.bf16.mxu0 %v2012_v0  ;;  %1609 = vmatprep.subr.bf16.mxu1 %v2012_v0  ;;  %v372_v52 = vld [vmem:[#allocation7] sm:$0xff]  ;;  %v373_v53 = vld [vmem:[#allocation7 + $0x8] sm:$0xff]  ;;  %v1622_v55 = vpack.c.bf16 %v491_v51, %v490_v50  ;;  %v1149_v38 = vld [vmem:[%s2388_s2 + $0x1] ss:$0 sm:$0xff] }
  0x7c   : > { %v1646_v56 = vpack.c.bf16 %v373_v53, %v372_v52  ;;  %v494_v63 = vld [vmem:[#allocation7 + $0xa0] sm:$0xff]  ;;  %v495_v2 = vld [vmem:[#allocation7 + $0xa8] sm:$0xff]  ;;  %v646_v58 = vld [vmem:[#allocation5 + $0x10] sm:$0xff] }
  0x7d   : > { %v1628_v3 = vpack.c.bf16 %v495_v2, %v494_v63  ;;  %v376_v4 = vld [vmem:[#allocation7 + $0x20] sm:$0xff]  ;;  %v377_v5 = vld [vmem:[#allocation7 + $0x28] sm:$0xff]  ;;  %v650_v8 = vld [vmem:[#allocation5 + $0x90] sm:$0xff] }
  0x7e   : > { %1587 = vmatpush3.bf16.msra.mxu0 %v1586_v30  ;;  %1611 = vmatpush3.bf16.msra.mxu1 %v1610_v31  ;;  %v1652_v6 = vpack.c.bf16 %v377_v5, %v376_v4  ;;  %v498_v13 = vld [vmem:[#allocation7 + $0xc0] sm:$0xff]  ;;  %v499_v14 = vld [vmem:[#allocation7 + $0xc8] sm:$0xff]  ;;  %v504_v31 = vld [vmem:[#allocation7 + $0xf0] sm:$0xff] }
  0x7f   : > { %1588 = vmatprep.subr.bf16.mxu0 %v2012_v0  ;;  %1612 = vmatprep.subr.bf16.mxu1 %v2012_v0  ;;  %v380_v15 = vld [vmem:[#allocation7 + $0x40] sm:$0xff]  ;;  %v1634_v16 = vpack.c.bf16 %v499_v14, %v498_v13  ;;  %v381_v17 = vld [vmem:[#allocation7 + $0x48] sm:$0xff]  ;;  %v1643_v35 = vpack.c.bf16 %v505_v32, %v504_v31  ;;  %v648_v5 = vld [vmem:[#allocation5 + $0x50] sm:$0xff] }
  0x80   : > { %v1658_v20 = vpack.c.bf16 %v381_v17, %v380_v15  ;;  %v502_v25 = vld [vmem:[#allocation7 + $0xe0] sm:$0xff]  ;;  %v503_v26 = vld [vmem:[#allocation7 + $0xe8] sm:$0xff]  ;;  %v652_v11 = vld [vmem:[#allocation5 + $0xd0] sm:$0xff] }
  0x81   : > { %v384_v27 = vld [vmem:[#allocation7 + $0x60] sm:$0xff]  ;;  %v385_v28 = vld [vmem:[#allocation7 + $0x68] sm:$0xff]  ;;  %v1640_v29 = vpack.c.bf16 %v503_v26, %v502_v25  ;;  %v654_v14 = vld [vmem:[#allocation5 + $0x110] sm:$0xff] }
  0x82   : > { %1590 = vmatpush3.bf16.msra.mxu0 %v1589_v36  ;;  %1614 = vmatpush3.bf16.msra.mxu1 %v1613_v37  ;;  %v1664_v30 = vpack.c.bf16 %v385_v28, %v384_v27  ;;  %v1667_v36 = vpack.c.bf16 %v387_v34, %v386_v33  ;;  %v1148_v37 = vld [vmem:[%s2388_s2] ss:$0 sm:$0xff]  ;;  %v835_v26 = vld [vmem:[#allocation5 + $0x18] sm:$0xff] }
  0x83   : > { %1591 = vmatprep.subr.bf16.mxu0 %v2012_v0  ;;  %1615 = vmatprep.subr.bf16.mxu1 %v2012_v0  ;;  %v655_v15 = vld [vmem:[#allocation5 + $0x130] sm:$0xff]  ;;  %v836_v27 = vld [vmem:[#allocation5 + $0x38] sm:$0xff] }
  0x84   : > { %v656_v17 = vld [vmem:[#allocation5 + $0x150] sm:$0xff]  ;;  %v1718_v28 = vpack.c.bf16 %v836_v27, %v835_v26  ;;  %v839_v32 = vld [vmem:[#allocation5 + $0x98] sm:$0xff]  ;;  %v937_v26 = vld [vmem:[#allocation7 + $0x180] sm:$0xff] }
  0x85   : > { %v657_v18 = vld [vmem:[#allocation5 + $0x170] sm:$0xff]  ;;  %v840_v33 = vld [vmem:[#allocation5 + $0xb8] sm:$0xff]  ;;  %v938_v27 = vld [vmem:[#allocation7 + $0x188] sm:$0xff] }
  0x86   : > { %1593 = vmatpush3.bf16.msra.mxu0 %v1592_v42  ;;  %1617 = vmatpush3.bf16.msra.mxu1 %v1616_v43  ;;  %v1685_v19 = vpack.c.bf16 %v657_v18, %v656_v17  ;;  %v659_v21 = vld [vmem:[#allocation5 + $0x1b0] sm:$0xff]  ;;  %v1724_v34 = vpack.c.bf16 %v840_v33, %v839_v32 }
  0x87   : > { %1594 = vmatprep.subr.bf16.mxu0 %v2012_v0  ;;  %1618 = vmatprep.subr.bf16.mxu1 %v2012_v0  ;;  %v1150_v17 = vld [vmem:[%s2388_s2 + $0x2] ss:$0 sm:$0xff] }
  0x88   : > { %v939_v33 = vld [vmem:[#allocation7 + $0x190] sm:$0xff] }
  0x8a   : > { %1596 = vmatpush3.bf16.msra.mxu0 %v1595_v48  ;;  %1620 = vmatpush3.bf16.msra.mxu1 %v1619_v49 }
  0x8b   : > { %1621 = vmatprep.subr.bf16.mxu0 %v2012_v0  ;;  %1645 = vmatprep.subr.bf16.mxu1 %v2012_v0 }
  0x8d   : > { %1326 = vmatmul.mubr.f32.vlgmr.msra.gmra.mrb[0].mxu0 %v2252_v54  ;;  %1361 = vmatmul.mubr.f32.vlgmr.msra.gmra.mrb[0].mxu1 %v2252_v54 }
  0x8e   : > { %1623 = vmatpush3.bf16.msra.mxu0 %v1622_v55  ;;  %1647 = vmatpush3.bf16.msra.mxu1 %v1646_v56 }
  0x8f   : > { %1624 = vmatprep.subr.bf16.mxu0 %v2012_v0  ;;  %1648 = vmatprep.subr.bf16.mxu1 %v2012_v0 }
  0x90   : > { %1395 = vmatprep.mubr.msk.f32.mxu0 %vm2013_vm0, %v2014_v1  ;;  %1430 = vmatprep.mubr.msk.f32.mxu1 %vm2013_vm0, %v2014_v1 }
  0x92   : > { %1626 = vmatpush3.bf16.msra.mxu0 %v1625_v59  ;;  %1650 = vmatpush3.bf16.msra.mxu1 %v1649_v62  ;;  %v647_v59 = vld [vmem:[#allocation5 + $0x30] sm:$0xff] }
  0x93   : > { %1627 = vmatprep.subr.bf16.mxu0 %v2012_v0  ;;  %1651 = vmatprep.subr.bf16.mxu1 %v2012_v0 }
  0x96   : > { %1629 = vmatpush3.bf16.msra.mxu0 %v1628_v3  ;;  %1653 = vmatpush3.bf16.msra.mxu1 %v1652_v6  ;;  %v1670_v3 = vpack.c.bf16 %v647_v59, %v646_v58  ;;  %v649_v6 = vld [vmem:[#allocation5 + $0x70] sm:$0xff]  ;;  %v753_v58 = vld [vmem:[#allocation7 + $0x128] sm:$0xff] }
  0x97   : > { %1630 = vmatprep.subr.bf16.mxu0 %v2012_v0  ;;  %1654 = vmatprep.subr.bf16.mxu1 %v2012_v0  ;;  %v1673_v7 = vpack.c.bf16 %v649_v6, %v648_v5  ;;  %v760_v6 = vld [vmem:[#allocation7 + $0x160] sm:$0xff] }
  0x9a   : > { %1632 = vmatpush3.bf16.msra.mxu0 %v1631_v9  ;;  %1656 = vmatpush3.bf16.msra.mxu1 %v1655_v12  ;;  %v651_v9 = vld [vmem:[#allocation5 + $0xb0] sm:$0xff] }
  0x9b   : > { %1633 = vmatprep.subr.bf16.mxu0 %v2012_v0  ;;  %1657 = vmatprep.subr.bf16.mxu1 %v2012_v0  ;;  %v1676_v10 = vpack.c.bf16 %v651_v9, %v650_v8  ;;  %v653_v12 = vld [vmem:[#allocation5 + $0xf0] sm:$0xff] }
  0x9c   : > { %v1679_v13 = vpack.c.bf16 %v653_v12, %v652_v11  ;;  %v762_v9 = vld [vmem:[#allocation7 + $0x170] sm:$0xff] }
  0x9e   : > { %1635 = vmatpush3.bf16.msra.mxu0 %v1634_v16  ;;  %1659 = vmatpush3.bf16.msra.mxu1 %v1658_v20  ;;  %v1682_v16 = vpack.c.bf16 %v655_v15, %v654_v14  ;;  %v658_v20 = vld [vmem:[#allocation5 + $0x190] sm:$0xff] }
  0x9f   : > { %1636 = vmatprep.subr.bf16.mxu0 %v2012_v0  ;;  %1660 = vmatprep.subr.bf16.mxu1 %v2012_v0  ;;  %v1688_v22 = vpack.c.bf16 %v659_v21, %v658_v20 }
  0xa2   : > { %1638 = vmatpush3.bf16.msra.mxu0 %v1637_v23  ;;  %1662 = vmatpush3.bf16.msra.mxu1 %v1661_v24  ;;  %v660_v23 = vld [vmem:[#allocation5 + $0x1d0] sm:$0xff] }
  0xa3   : > { %1639 = vmatprep.subr.bf16.mxu0 %v2012_v0  ;;  %1663 = vmatprep.subr.bf16.mxu1 %v2012_v0  ;;  %v661_v24 = vld [vmem:[#allocation5 + $0x1f0] sm:$0xff] }
  0xa4   : > { %v1691_v25 = vpack.c.bf16 %v661_v24, %v660_v23 }
  0xa6   : > { %1641 = vmatpush3.bf16.msra.mxu0 %v1640_v29  ;;  %1665 = vmatpush3.bf16.msra.mxu1 %v1664_v30  ;;  %v837_v29 = vld [vmem:[#allocation5 + $0x58] sm:$0xff] }
  0xa7   : > { %1642 = vmatprep.subr.bf16.mxu0 %v2012_v0  ;;  %1666 = vmatprep.subr.bf16.mxu1 %v2012_v0  ;;  %v838_v30 = vld [vmem:[#allocation5 + $0x78] sm:$0xff] }
  0xa8   : > { %v1721_v31 = vpack.c.bf16 %v838_v30, %v837_v29 }
  0xaa   : > { %1644 = vmatpush3.bf16.msra.mxu0 %v1643_v35  ;;  %1668 = vmatpush3.bf16.msra.mxu1 %v1667_v36  ;;  %v841_v35 = vld [vmem:[#allocation5 + $0xd8] sm:$0xff] }
  0xab   : > { %1669 = vmatprep.subr.bf16.mxu0 %v2012_v0  ;;  %1693 = vmatprep.subr.bf16.mxu1 %v2012_v0  ;;  %v842_v36 = vld [vmem:[#allocation5 + $0xf8] sm:$0xff] }
 0x160   : > { %v359_v39 = vpop.f32.mrb[0].mxu0  ;;  %v477_v41 = vpop.f32.mrb[0].mxu1 }
 0x161   : > { %v360_v40 = vadd.f32 %v1148_v37, %v359_v39  ;;  %v1327_v42 = vpop.f32.mrb[1].mxu0  ;;  %v478_v43 = vadd.f32 %v1149_v38, %v477_v41  ;;  %v1362_v44 = vpop.f32.mrb[1].mxu1  ;;  %v1727_v37 = vpack.c.bf16 %v842_v36, %v841_v35  ;;  %v843_v38 = vld [vmem:[#allocation5 + $0x118] sm:$0xff]  ;;  %v1151_v36 = vld [vmem:[%s2388_s2 + $0x3] ss:$0 sm:$0xff] }
 0x162   : > { %v844_v39 = vld [vmem:[#allocation5 + $0x138] sm:$0xff] }
 0x163   : > { %v364_v45 = vmul.f32 0.044715, %v360_v40  ;;  %v482_v46 = vmul.f32 0.044715, %v478_v43  ;;  %v363_v56 = vmul.f32 0.5, %v360_v40  ;;  %v481_v62 = vmul.f32 0.5, %v478_v43 }
 0x164   : > { %v845_v41 = vld [vmem:[#allocation5 + $0x158] sm:$0xff] }
 0x165   : > { %v365_v47 = vmul.f32 %v364_v45, %v360_v40  ;;  %v483_v48 = vmul.f32 %v482_v46, %v478_v43  ;;  %v846_v42 = vld [vmem:[#allocation5 + $0x178] sm:$0xff] }
 0x166   : > { %v847_v44 = vld [vmem:[#allocation5 + $0x198] sm:$0xff] }
 0x167   : > { %v366_v49 = vmul.f32 %v365_v47, %v360_v40  ;;  %v484_v50 = vmul.f32 %v483_v48, %v478_v43  ;;  %v848_v45 = vld [vmem:[#allocation5 + $0x1b8] sm:$0xff] }
 0x168   : > { %v1736_v46 = vpack.c.bf16 %v848_v45, %v847_v44  ;;  %v849_v47 = vld [vmem:[#allocation5 + $0x1d8] sm:$0xff] }
 0x169   : > { %v367_v51 = vadd.f32 %v366_v49, %v360_v40  ;;  %v485_v52 = vadd.f32 %v484_v50, %v478_v43  ;;  %v1730_v40 = vpack.c.bf16 %v844_v39, %v843_v38  ;;  %v1733_v43 = vpack.c.bf16 %v846_v42, %v845_v41  ;;  %v850_v48 = vld [vmem:[#allocation5 + $0x1f8] sm:$0xff]  ;;  %v748_v50 = vld [vmem:[#allocation7 + $0x100] sm:$0xff]  ;;  %v942_v38 = vld [vmem:[#allocation7 + $0x1a8] sm:$0xff] }
 0x16a   : > { %v1739_v49 = vpack.c.bf16 %v850_v48, %v849_v47  ;;  %v944_v44 = vld [vmem:[#allocation7 + $0x1b8] sm:$0xff]  ;;  %v945_v47 = vld [vmem:[#allocation7 + $0x1c0] sm:$0xff]  ;;  %v946_v48 = vld [vmem:[#allocation7 + $0x1c8] sm:$0xff] }
 0x16b   : > { %v368_v53 = vmul.f32 0.7978846, %v367_v51  ;;  %v486_v55 = vmul.f32 0.7978846, %v485_v52  ;;  %v749_v51 = vld [vmem:[#allocation7 + $0x108] sm:$0xff] }
 0x16c   : > { %v1694_v52 = vpack.c.bf16 %v749_v51, %v748_v50  ;;  %v1754_v51 = vpack.c.bf16 %v946_v48, %v945_v47 }
 0x16d   : > { %1839 = vtanh.f32 %v368_v53  ;;  %v750_v53 = vld [vmem:[#allocation7 + $0x110] sm:$0xff] }
 0x16e   : > { %1841 = vtanh.f32 %v486_v55  ;;  %v751_v55 = vld [vmem:[#allocation7 + $0x118] sm:$0xff] }
 0x177   : > { %v1840_v57 = vpop.eup %1839 }
 0x178   : > { %v1842_v60 = vpop.eup %1841  ;;  %v370_v61 = vadd.f32 1.0, %v1840_v57  ;;  %v752_v57 = vld [vmem:[#allocation7 + $0x120] sm:$0xff] }
 0x179   : > { %v488_v63 = vadd.f32 1.0, %v1842_v60  ;;  %v1700_v59 = vpack.c.bf16 %v753_v58, %v752_v57  ;;  %v754_v60 = vld [vmem:[#allocation7 + $0x130] sm:$0xff]  ;;  %v949_v57 = vld [vmem:[#allocation7 + $0x1e0] sm:$0xff]  ;;  %v950_v58 = vld [vmem:[#allocation7 + $0x1e8] sm:$0xff] }
 0x17a   : > { %v371_v2 = vmul.f32 %v370_v61, %v363_v56  ;;  %v1697_v56 = vpack.c.bf16 %v751_v55, %v750_v53  ;;  %v948_v53 = vld [vmem:[#allocation7 + $0x1d8] sm:$0xff] }
 0x17b   : > { %v489_v4 = vmul.f32 %v488_v63, %v481_v62  ;;  %v756_v62 = vld [vmem:[#allocation7 + $0x140] sm:$0xff]  ;;  %v757_v63 = vld [vmem:[#allocation7 + $0x148] sm:$0xff] }
 0x17c   : > { %1431 = vmatmul.mubr.f32.vlgmr.msra.gmra.mrb[2].mxu1 %v371_v2  ;;  %v1706_v2 = vpack.c.bf16 %v757_v63, %v756_v62 }
 0x17d   : > { %1396 = vmatmul.mubr.f32.vlgmr.msra.gmra.mrb[2].mxu0 %v489_v4  ;;  %1500 = vmatprep.mubr.msk.f32.mxu1 %vm2013_vm0, %v2014_v1  ;;  %v759_v4 = vld [vmem:[#allocation7 + $0x158] sm:$0xff] }
 0x17e   : > { %1671 = vmatpush3.bf16.msra.mxu0 %v1670_v3  ;;  %1465 = vmatprep.mubr.msk.f32.mxu0 %vm2013_vm0, %v2014_v1  ;;  %v758_v3 = vld [vmem:[#allocation7 + $0x150] sm:$0xff] }
 0x17f   : > { %1672 = vmatprep.subr.bf16.mxu0 %v2012_v0  ;;  %1695 = vmatpush3.bf16.msra.mxu1 %v1694_v52  ;;  %v1709_v5 = vpack.c.bf16 %v759_v4, %v758_v3  ;;  %v947_v52 = vld [vmem:[#allocation7 + $0x1d0] sm:$0xff] }
 0x180   : > { %1696 = vmatprep.subr.bf16.mxu1 %v2012_v0 }
 0x182   : > { %1674 = vmatpush3.bf16.msra.mxu0 %v1673_v7  ;;  %v761_v7 = vld [vmem:[#allocation7 + $0x168] sm:$0xff] }
 0x183   : > { %1675 = vmatprep.subr.bf16.mxu0 %v2012_v0  ;;  %1698 = vmatpush3.bf16.msra.mxu1 %v1697_v56  ;;  %v1712_v8 = vpack.c.bf16 %v761_v7, %v760_v6  ;;  %v1757_v56 = vpack.c.bf16 %v948_v53, %v947_v52 }
 0x184   : > { %1699 = vmatprep.subr.bf16.mxu1 %v2012_v0 }
 0x186   : > { %1677 = vmatpush3.bf16.msra.mxu0 %v1676_v10  ;;  %v763_v10 = vld [vmem:[#allocation7 + $0x178] sm:$0xff] }
 0x187   : > { %1678 = vmatprep.subr.bf16.mxu0 %v2012_v0  ;;  %1701 = vmatpush3.bf16.msra.mxu1 %v1700_v59  ;;  %v1715_v11 = vpack.c.bf16 %v763_v10, %v762_v9  ;;  %v1760_v59 = vpack.c.bf16 %v950_v58, %v949_v57 }
 0x188   : > { %1702 = vmatprep.subr.bf16.mxu1 %v2012_v0 }
 0x18a   : > { %1680 = vmatpush3.bf16.msra.mxu0 %v1679_v13 }
 0x18b   : > { %1681 = vmatprep.subr.bf16.mxu0 %v2012_v0 }
 0x18e   : > { %1683 = vmatpush3.bf16.msra.mxu0 %v1682_v16 }
 0x18f   : > { %1684 = vmatprep.subr.bf16.mxu0 %v2012_v0 }
 0x192   : > { %1686 = vmatpush3.bf16.msra.mxu0 %v1685_v19 }
 0x193   : > { %1687 = vmatprep.subr.bf16.mxu0 %v2012_v0 }
 0x196   : > { %1689 = vmatpush3.bf16.msra.mxu0 %v1688_v22 }
 0x197   : > { %1690 = vmatprep.subr.bf16.mxu0 %v2012_v0 }
 0x19a   : > { %1692 = vmatpush3.bf16.msra.mxu0 %v1691_v25 }
 0x19b   : > { %1717 = vmatprep.subr.bf16.mxu0 %v2012_v0 }
 0x19d   : > { %1466 = vmatmul.mubr.f32.vlgmr.msra.gmra.mrb[4].mxu0 %v2252_v54 }
 0x19e   : > { %1719 = vmatpush3.bf16.msra.mxu0 %v1718_v28  ;;  %1535 = vmatprep.mubr.msk.f32.mxu0 %vm2013_vm0, %v2014_v1 }
 0x19f   : > { %1720 = vmatprep.subr.bf16.mxu0 %v2012_v0 }
 0x1a2   : > { %1722 = vmatpush3.bf16.msra.mxu0 %v1721_v31  ;;  %v1742_v31 = vpack.c.bf16 %v938_v27, %v937_v26 }
 0x1a3   : > { %1723 = vmatprep.subr.bf16.mxu0 %v2012_v0 }
 0x1a6   : > { %1725 = vmatpush3.bf16.msra.mxu0 %v1724_v34  ;;  %v940_v34 = vld [vmem:[#allocation7 + $0x198] sm:$0xff] }
 0x1a7   : > { %1726 = vmatprep.subr.bf16.mxu0 %v2012_v0  ;;  %v1745_v35 = vpack.c.bf16 %v940_v34, %v939_v33 }
 0x1aa   : > { %1728 = vmatpush3.bf16.msra.mxu0 %v1727_v37  ;;  %v941_v37 = vld [vmem:[#allocation7 + $0x1a0] sm:$0xff] }
 0x1ab   : > { %1729 = vmatprep.subr.bf16.mxu0 %v2012_v0  ;;  %v1748_v42 = vpack.c.bf16 %v942_v38, %v941_v37 }
 0x1ae   : > { %1731 = vmatpush3.bf16.msra.mxu0 %v1730_v40 }
 0x1af   : > { %1732 = vmatprep.subr.bf16.mxu0 %v2012_v0 }
 0x1b2   : > { %1734 = vmatpush3.bf16.msra.mxu0 %v1733_v43  ;;  %v943_v43 = vld [vmem:[#allocation7 + $0x1b0] sm:$0xff] }
 0x1b3   : > { %1735 = vmatprep.subr.bf16.mxu0 %v2012_v0 }
 0x1b6   : > { %1737 = vmatpush3.bf16.msra.mxu0 %v1736_v46 }
 0x1b7   : > { %1738 = vmatprep.subr.bf16.mxu0 %v2012_v0 }
 0x1ba   : > { %1740 = vmatpush3.bf16.msra.mxu0 %v1739_v49 }
 0x1bd   : > { %1536 = vmatmul.mubr.f32.vlgmr.msra.gmra.mrb[6].mxu0 %v2252_v54  ;;  %v755_v54 = vld [vmem:[#allocation7 + $0x138] sm:$0xff] }
 0x1be   : > { %v1703_v61 = vpack.c.bf16 %v755_v54, %v754_v60  ;;  %v951_v60 = vld [vmem:[#allocation7 + $0x1f0] sm:$0xff]  ;;  %v952_v54 = vld [vmem:[#allocation7 + $0x1f8] sm:$0xff] }
 0x1c0   : > { %1704 = vmatpush3.bf16.msra.mxu1 %v1703_v61  ;;  %v1763_v61 = vpack.c.bf16 %v952_v54, %v951_v60 }
 0x1c1   : > { %1705 = vmatprep.subr.bf16.mxu1 %v2012_v0 }
 0x1c4   : > { %1707 = vmatpush3.bf16.msra.mxu1 %v1706_v2 }
 0x1c5   : > { %1708 = vmatprep.subr.bf16.mxu1 %v2012_v0 }
 0x1c8   : > { %1710 = vmatpush3.bf16.msra.mxu1 %v1709_v5 }
 0x1c9   : > { %1711 = vmatprep.subr.bf16.mxu1 %v2012_v0 }
 0x1cc   : > { %1713 = vmatpush3.bf16.msra.mxu1 %v1712_v8  ;;  %v1152_v8 = vld [vmem:[%s2390_s4] ss:$0 sm:$0xff] }
 0x1cd   : > { %1714 = vmatprep.subr.bf16.mxu1 %v2012_v0 }
 0x1d0   : > { %1716 = vmatpush3.bf16.msra.mxu1 %v1715_v11 }
 0x1d1   : > { %1741 = vmatprep.subr.bf16.mxu1 %v2012_v0 }
 0x24f   : > { %v642_v12 = vpop.f32.mrb[2].mxu1 }
 0x250   : > { %v572_v13 = vpop.f32.mrb[2].mxu0  ;;  %v1432_v14 = vpop.f32.mrb[3].mxu1 }
 0x251   : > { %v2315_v15 = vadd.f32 %v642_v12, %v572_v13  ;;  %v1397_v16 = vpop.f32.mrb[3].mxu0 }
 0x270   : > { %v735_v18 = vpop.f32.mrb[4].mxu0 }
 0x271   : > { %v736_v19 = vadd.f32 %v1150_v17, %v735_v18  ;;  %v1467_v20 = vpop.f32.mrb[5].mxu0 }
 0x273   : > { %v740_v21 = vmul.f32 0.044715, %v736_v19  ;;  %v739_v29 = vmul.f32 0.5, %v736_v19 }
 0x275   : > { %v741_v22 = vmul.f32 %v740_v21, %v736_v19 }
 0x277   : > { %v742_v23 = vmul.f32 %v741_v22, %v736_v19 }
 0x279   : > { %v743_v24 = vadd.f32 %v742_v23, %v736_v19 }
 0x27b   : > { %v744_v25 = vmul.f32 0.7978846, %v743_v24 }
 0x27d   : > { %1843 = vtanh.f32 %v744_v25 }
 0x287   : > { %v1844_v28 = vpop.eup %1843 }
 0x288   : > { %v746_v30 = vadd.f32 1.0, %v1844_v28 }
 0x28a   : > { %v747_v32 = vmul.f32 %v746_v30, %v739_v29 }
 0x28c   : > { %1501 = vmatmul.mubr.f32.vlgmr.msra.gmra.mrb[4].mxu1 %v747_v32 }
 0x28d   : > { %1743 = vmatpush3.bf16.msra.mxu1 %v1742_v31  ;;  %1570 = vmatprep.mubr.msk.f32.mxu1 %vm2013_vm0, %v2014_v1  ;;  %v1751_v1 = vpack.c.bf16 %v944_v44, %v943_v43 }
 0x28e   : > { %1744 = vmatprep.subr.bf16.mxu1 %v2012_v0 }
 0x290   : > { %v924_v39 = vpop.f32.mrb[6].mxu0 }
 0x291   : > { %v925_v40 = vadd.f32 %v1151_v36, %v924_v39  ;;  %v1537_v41 = vpop.f32.mrb[7].mxu0  ;;  %1746 = vmatpush3.bf16.msra.mxu1 %v1745_v35 }
 0x292   : > { %1747 = vmatprep.subr.bf16.mxu1 %v2012_v0 }
 0x293   : > { %v929_v45 = vmul.f32 0.044715, %v925_v40  ;;  %v928_v63 = vmul.f32 0.5, %v925_v40 }
 0x295   : > { %v930_v46 = vmul.f32 %v929_v45, %v925_v40  ;;  %1749 = vmatpush3.bf16.msra.mxu1 %v1748_v42 }
 0x296   : > { %1750 = vmatprep.subr.bf16.mxu1 %v2012_v0 }
 0x297   : > { %v931_v49 = vmul.f32 %v930_v46, %v925_v40 }
 0x299   : > { %v932_v50 = vadd.f32 %v931_v49, %v925_v40  ;;  %1752 = vmatpush3.bf16.msra.mxu1 %v1751_v1 }
 0x29a   : > { %1753 = vmatprep.subr.bf16.mxu1 %v2012_v0 }
 0x29b   : > { %v933_v55 = vmul.f32 0.7978846, %v932_v50 }
 0x29d   : > { %1755 = vmatpush3.bf16.msra.mxu1 %v1754_v51  ;;  %1845 = vtanh.f32 %v933_v55 }
 0x29e   : > { %1756 = vmatprep.subr.bf16.mxu1 %v2012_v0 }
 0x2a1   : > { %1758 = vmatpush3.bf16.msra.mxu1 %v1757_v56 }
 0x2a2   : > { %1759 = vmatprep.subr.bf16.mxu1 %v2012_v0 }
 0x2a5   : > { %1761 = vmatpush3.bf16.msra.mxu1 %v1760_v59 }
 0x2a6   : > { %1762 = vmatprep.subr.bf16.mxu1 %v2012_v0 }
 0x2a7   : > { %v1846_v62 = vpop.eup %1845 }
 0x2a8   : > { %v935_v2 = vadd.f32 1.0, %v1846_v62 }
 0x2a9   : > { %1764 = vmatpush3.bf16.msra.mxu1 %v1763_v61 }
 0x2aa   : > { %v936_v3 = vmul.f32 %v935_v2, %v928_v63 }
 0x2ac   : > { %1571 = vmatmul.mubr.f32.vlgmr.msra.gmra.mrb[6].mxu1 %v936_v3 }
 0x35f   : > { %v830_v4 = vpop.f32.mrb[4].mxu1 }
 0x360   : > { %v834_v5 = vadd.f32 %v830_v4, %v2315_v15  ;;  %v1502_v6 = vpop.f32.mrb[5].mxu1 }
 0x37f   : > { %v1019_v7 = vpop.f32.mrb[6].mxu1 }
 0x380   : > { %v1023_v0 = vadd.f32 %v1019_v7, %v834_v5  ;;  %v1572_v9 = vpop.f32.mrb[7].mxu1 }
 0x382   : > { %v1031_v10 = vadd.f32 %v1152_v8, %v1023_v0 }
 0x384   : > { %1032 = vst [vmem:[%s268_s11] sm:$0xff] %v1031_v10 }
 0x385   : > { %1946 = shalt.err (!%p1943_p2)
}
 0x386   : > { %s1947_s14 = scalar_lea.hbm %s2342_s26, 128  ;;  %s1951_s6 = scalar_lea.hbm %s2391_s5, 256 }
 0x387   : > { %p1948_p13 = scmp.ne.s32.totalorder %s2342_s26, %s1947_s14  ;;  %p1952_p4 = scmp.lt.u32.totalorder %s2342_s26, %s2391_s5 }
 0x388   : > { %p1953_p7 = scmp.lt.u32.totalorder %s1951_s6, %s1947_s14  ;;  %p1955_p11 = scmp.lt.u32.totalorder %s1947_s14, %s2342_s26 }
 0x389   : > { %p1949_p6 = pnand %p1948_p13, %p2405_p0 }
 0x38a   : > { %p1954_p8 = por %p1953_p7, %p1952_p4 }
 0x38b   : > { %p1950_p10 = pneg %p1949_p6 }
 0x38c   : > { %p1956_p1 = por %p1955_p11, %p1954_p8 }
 0x38e   : > { %p1957_p3 = pnand %p1956_p1, %p1950_p10 }
 0x390   : > { %1960 = shalt.err (!%p1957_p3)
}
 0x391   : > { %1775 = dma.vmem_to_hbm [thread:$0]  (%p2405_p0), %s2344_s17, 128, %s2342_s26, %s1034_s10  }
 0x392 PF: > { %s1059_s9 = sand.u32 1, %s1991_s18   ;;  %p2406_p5 = scmp.ne.s32.totalorder %s2396_s25, 0 }
 0x393   : > { %p2407_p9 = scmp.ge.s32.totalorder %s2003_s21, 2  ;;  %s1060_s11 = scalar_lea.sflag [#allocation4], %s1059_s9 }
 0x395   : > { %p1789_p12 = pnand %p2407_p9, %p2406_p5 }
 0x397   : > { %1986 = dma.done.wait (!%p1789_p12), %s1060_s11, 128  }
 0x398   : > { %1988 = vsyncadd (!%p1789_p12), %s1060_s11, 4294967168  ;;  %p19_p2 = scmp.ge.s32.totalorder %s2156_s16, 4   ;;  %s2408_s18 = smov %s1995_s19 }
 0x399   : > { %s2409_s19 = smov %s1999_s20  ;;  %s2410_s20 = smov %s2165_s27 }
 0x39a   : > { %s2411_s21 = smov %s2156_s16  ;;  %21 = sbr.rel (!%p19_p2) target bundleno = 6 (0x6), region = 93 }
 0x3a1   :  { %1065 = vsyncpa [#allocation3], 1 }
 0x3a2   :  { %1067 = vsyncpa [#allocation3 + $0x1], 1 }
 0x3a3   :  { %1068 = vsyncpa [#allocation6], 1 }
 0x3a4   :  { %1069 = vsyncpa [#allocation4], 1 }
 0x3a5   :  { %1071 = vsyncpa [#allocation4 + $0x1], 1 }

</bundles_post_ra>
